<compile_context>
chip_gen: v6e
topology: v6e:2x2x1
jax: 0.10.0
libtpu: 0.0.40
codegen_flags: <defaults>
</compile_context>

<pallas_src>
import math
from functools import partial

import jax
import jax.numpy as jnp
from jax import lax
from jax.experimental import pallas as pl
from jax.experimental.pallas import tpu as pltpu

_LANES = 128
_MAX_TILE_M = 2048  # rows of a 128-lane tile (multiple of 16); ~8 MiB double-buffered


def _round_up(x, m):
    return ((x + m - 1) // m) * m


def _spectrum_adjust_kernel(p_ref, z_ref, o_ref):
    # p_ref: (4, tile_m, 128) bf16   -> relu'd W1, B1, W2, B2 (clamped/cast in wrapper)
    # z_ref: (2, 1, tile_m, 128) f32 -> real / imag planes of rfftn(x)
    # o_ref: (2, 1, tile_m, 128) f32 -> adjusted spectrum (aliased onto z in HBM)
    re = z_ref[0, 0]
    im = z_ref[1, 0]
    w1 = p_ref[0].astype(jnp.float32)
    b1 = p_ref[1].astype(jnp.float32)
    w2 = p_ref[2].astype(jnp.float32)
    b2 = p_ref[3].astype(jnp.float32)

    mag2 = re * re + im * im
    # One exact rsqrt per element (EUP) instead of sqrt + reciprocal.
    # rsqrt(mag2 + 1e-32) == 1/(spectrum + 1e-16) at spectrum == 0 and matches the
    # reference denominator to ~ulp for any non-degenerate spectrum.
    inv = lax.rsqrt(mag2 + 1e-32)
    spectrum = mag2 * inv
    act = jnp.maximum(w1 * spectrum + b1, 0.0)            # relu activation
    gain = (w2 * act + b2) * inv
    # Zero-spectrum keep-path (also covers the zero padding): select on the small
    # gain plane rather than twice on the (2, ...) slab.
    gain = jnp.where(mag2 == 0.0, 1.0, gain)
    o_ref[0, 0] = re * gain
    o_ref[1, 0] = im * gain


@partial(jax.jit, static_argnames=("size",))
def _general_adaptive_forward(x, w1, b1, w2, b2, *, size):
    dims = tuple(range(1, 1 + len(size)))
    rft = jnp.fft.rfftn(x.astype(jnp.float32), axes=dims)  # complex64, (B,)+filter_size
    fshape = rft.shape
    B = fshape[0]
    N = math.prod(fshape[1:])

    # Balanced row tiles (never round rows up to a full _MAX_TILE_M multiple).
    rows = pl.cdiv(N, _LANES)
    num_row_tiles = pl.cdiv(rows, _MAX_TILE_M)
    if B == 1 and num_row_tiles == 1 and rows > 16:
        num_row_tiles = 2          # keep >= 2 parallel grid steps for v7x's 2 TCs
    tile_m = _round_up(pl.cdiv(rows, num_row_tiles), 16)   # 16: bf16 sublane packing
    rows_pad = tile_m * num_row_tiles
    pad = rows_pad * _LANES - N

    # Planar lane-dense slab (2, B, rows_pad, 128) = real / imag planes; fuses with the
    # rfft output read under jit into a single HBM pass.
    # TODO(synk): a zero-copy interleaved f32 view of the complex buffer would drop one
    # more HBM pass, but lax.bitcast_convert_type does not support complex64, so the
    # real/imag split still costs one (fused) pass.
    z = jnp.stack([jnp.real(rft).reshape(B, N), jnp.imag(rft).reshape(B, N)], axis=0)
    z = jnp.pad(z, ((0, 0), (0, 0), (0, pad))).reshape(2, B, rows_pad, _LANES)

    # Params: ReLU hoisted onto the tiny raw params, packed into one slab, shipped bf16.
    params = jnp.stack(
        [jnp.maximum(p.astype(jnp.float32), 0.0).reshape(N) for p in (w1, b1, w2, b2)])
    params = jnp.pad(params, ((0, 0), (0, pad)))
    params = params.reshape(4, rows_pad, _LANES).astype(jnp.bfloat16)

    grid = (num_row_tiles, B)   # batch innermost -> param block stays VMEM-resident
    z_spec = pl.BlockSpec((2, 1, tile_m, _LANES), lambda r, b: (0, b, r, 0))
    p_spec = pl.BlockSpec((4, tile_m, _LANES), lambda r, b: (0, r, 0))

    out = pl.pallas_call(
        _spectrum_adjust_kernel,
        out_shape=jax.ShapeDtypeStruct((2, B, rows_pad, _LANES), jnp.float32),
        grid=grid,
        in_specs=[p_spec, z_spec],
        out_specs=z_spec,
        input_output_aliases={1: 0},           # adjust the spectrum slab in place
        compiler_params=pltpu.CompilerParams(
            dimension_semantics=("parallel", "parallel"),
            vmem_limit_bytes=32 * 1024 * 1024),
    )(params, z)

    out = out.reshape(2, B, rows_pad * _LANES)[:, :, :N]
    adjusted = lax.complex(out[0], out[1]).reshape(fshape)
    # s= keeps odd spatial sizes round-tripping to the original input shape.
    return jnp.fft.irfftn(adjusted, s=size, axes=dims)


class GeneralAdaptiveLayer:
    """JAX/Pallas port of the PyTorch GeneralAdaptiveLayer
    (adjustment='general_spectrum', activation='relu')."""

    def __init__(self, size, adjustment="general_spectrum",
                 activation_function_name="relu"):
        assert adjustment == "general_spectrum"
        # TODO(synk): only 'relu' is wired into the kernel; sigmoid/tanh/softplus/
        # swish/mish are a one-line swap of `act` in _spectrum_adjust_kernel.
        assert activation_function_name == "relu"
        self.size = tuple(size)
        filter_size = self.size[:-1] + (self.size[-1] // 2 + 1,)
        # Deterministic init identical to the PyTorch module (ones / zeros).
        self.W1 = jnp.ones(filter_size, jnp.float32)
        self.B1 = jnp.zeros(filter_size, jnp.float32)
        self.W2 = jnp.ones(filter_size, jnp.float32)
        self.B2 = jnp.zeros(filter_size, jnp.float32)

    def __call__(self, x):
        assert tuple(x.shape[1:]) == self.size
        return _general_adaptive_forward(x, self.W1, self.B1, self.W2, self.B2,
                                         size=self.size)


def _reference_forward(layer, x):
    """Pure-JAX reference mirroring the PyTorch forward, for validation."""
    dims = tuple(range(1, 1 + len(layer.size)))
    rft = jnp.fft.rfftn(x, axes=dims)
    w1 = jnp.maximum(layer.W1, 0.0)[None]
    b1 = jnp.maximum(layer.B1, 0.0)[None]
    w2 = jnp.maximum(layer.W2, 0.0)[None]
    b2 = jnp.maximum(layer.B2, 0.0)[None]
    spectrum = jnp.sqrt(jnp.real(rft) ** 2 + jnp.imag(rft) ** 2)
    adj = jnp.where(spectrum == 0.0, rft,
                    rft / (spectrum + 1e-16)
                    * (w2 * jnp.maximum(w1 * spectrum + b1, 0.0) + b2))
    return jnp.fft.irfftn(adj, s=layer.size, axes=dims)


if __name__ == "__main__":
    key = jax.random.PRNGKey(0)
    kx, kw1, kb1, kw2, kb2 = jax.random.split(key, 5)
    B, C, H, W = 2, 4, 16, 16
    x = jax.random.normal(kx, (B, C, H, W), dtype=jnp.float32)

    layer = GeneralAdaptiveLayer((C, H, W))
    fs = layer.W1.shape
    # Exercise non-trivial parameters; values are rounded to bf16-representable so the
    # kernel's bf16 param slab introduces no extra error versus the f32 reference.
    _bf16_vals = lambda a: a.astype(jnp.bfloat16).astype(jnp.float32)
    layer.W1 = _bf16_vals(1.0 + 0.25 * jax.random.normal(kw1, fs, jnp.float32))
    layer.B1 = _bf16_vals(0.25 * jax.random.normal(kb1, fs, jnp.float32))
    layer.W2 = _bf16_vals(1.0 + 0.25 * jax.random.normal(kw2, fs, jnp.float32))
    layer.B2 = _bf16_vals(0.25 * jax.random.normal(kb2, fs, jnp.float32))

    y = layer(x)
    jax.block_until_ready(y)

    y_ref = _reference_forward(layer, x)
    assert y.shape == x.shape
    # Tolerance covers hardware rsqrt rounding; observed error is ~1e-6 level.
    assert jnp.allclose(y, y_ref, atol=1e-3, rtol=1e-3)
    print("KERNEL_OK")
</pallas_src>

<mosaic_0001>
module attributes {stable_mosaic.version = 11 : i64} {
  func.func @_spectrum_adjust_kernel(%arg0: i32, %arg1: i32, %arg2: memref<4x16x128xbf16, #tpu.memory_space<vmem>>, %arg3: memref<2x1x16x128xf32, #tpu.memory_space<vmem>>, %arg4: memref<2x1x16x128xf32, #tpu.memory_space<vmem>>) attributes {dimension_semantics = [#tpu.dimension_semantics<parallel>, #tpu.dimension_semantics<parallel>], iteration_bounds = array<i64: 1, 2>, scalar_prefetch = 0 : i64, scratch_operands = 0 : i64, tpu.core_type = #tpu.core_type<tc>, window_params = [{transform_indices = @transform_0, window_bounds = array<i64: 4, 16, 128>}, {transform_indices = @transform_1, window_bounds = array<i64: 2, 1, 16, 128>}, {transform_indices = @transform_2, window_bounds = array<i64: 2, 1, 16, 128>}]} {
    %c0 = arith.constant 0 : index
    %c0_0 = arith.constant 0 : index
    %c0_1 = arith.constant 0 : index
    %c0_2 = arith.constant 0 : index
    %0 = vector.load %arg3[%c0, %c0_0, %c0_1, %c0_2] : memref<2x1x16x128xf32, #tpu.memory_space<vmem>>, vector<1x1x16x128xf32>
    %1 = vector.shape_cast %0 : vector<1x1x16x128xf32> to vector<16x128xf32>
    %c1 = arith.constant 1 : index
    %c0_3 = arith.constant 0 : index
    %c0_4 = arith.constant 0 : index
    %c0_5 = arith.constant 0 : index
    %2 = vector.load %arg3[%c1, %c0_3, %c0_4, %c0_5] : memref<2x1x16x128xf32, #tpu.memory_space<vmem>>, vector<1x1x16x128xf32>
    %3 = vector.shape_cast %2 : vector<1x1x16x128xf32> to vector<16x128xf32>
    %c0_6 = arith.constant 0 : index
    %c0_7 = arith.constant 0 : index
    %c0_8 = arith.constant 0 : index
    %4 = vector.load %arg2[%c0_6, %c0_7, %c0_8] : memref<4x16x128xbf16, #tpu.memory_space<vmem>>, vector<1x16x128xbf16>
    %5 = vector.shape_cast %4 : vector<1x16x128xbf16> to vector<16x128xbf16>
    %6 = arith.extf %5 : vector<16x128xbf16> to vector<16x128xf32>
    %c1_9 = arith.constant 1 : index
    %c0_10 = arith.constant 0 : index
    %c0_11 = arith.constant 0 : index
    %7 = vector.load %arg2[%c1_9, %c0_10, %c0_11] : memref<4x16x128xbf16, #tpu.memory_space<vmem>>, vector<1x16x128xbf16>
    %8 = vector.shape_cast %7 : vector<1x16x128xbf16> to vector<16x128xbf16>
    %9 = arith.extf %8 : vector<16x128xbf16> to vector<16x128xf32>
    %c2 = arith.constant 2 : index
    %c0_12 = arith.constant 0 : index
    %c0_13 = arith.constant 0 : index
    %10 = vector.load %arg2[%c2, %c0_12, %c0_13] : memref<4x16x128xbf16, #tpu.memory_space<vmem>>, vector<1x16x128xbf16>
    %11 = vector.shape_cast %10 : vector<1x16x128xbf16> to vector<16x128xbf16>
    %12 = arith.extf %11 : vector<16x128xbf16> to vector<16x128xf32>
    %c3 = arith.constant 3 : index
    %c0_14 = arith.constant 0 : index
    %c0_15 = arith.constant 0 : index
    %13 = vector.load %arg2[%c3, %c0_14, %c0_15] : memref<4x16x128xbf16, #tpu.memory_space<vmem>>, vector<1x16x128xbf16>
    %14 = vector.shape_cast %13 : vector<1x16x128xbf16> to vector<16x128xbf16>
    %15 = arith.extf %14 : vector<16x128xbf16> to vector<16x128xf32>
    %16 = arith.mulf %1, %1 : vector<16x128xf32>
    %17 = arith.mulf %3, %3 : vector<16x128xf32>
    %18 = arith.addf %16, %17 : vector<16x128xf32>
    %cst = arith.constant 1.000000e-32 : f32
    %19 = vector.broadcast %cst : f32 to vector<16x128xf32>
    %20 = arith.addf %18, %19 : vector<16x128xf32>
    %21 = math.rsqrt %20 : vector<16x128xf32>
    %22 = arith.mulf %18, %21 : vector<16x128xf32>
    %23 = arith.mulf %6, %22 : vector<16x128xf32>
    %24 = arith.addf %23, %9 : vector<16x128xf32>
    %cst_16 = arith.constant 0.000000e+00 : f32
    %25 = vector.broadcast %cst_16 : f32 to vector<16x128xf32>
    %26 = arith.maximumf %24, %25 : vector<16x128xf32>
    %27 = arith.mulf %12, %26 : vector<16x128xf32>
    %28 = arith.addf %27, %15 : vector<16x128xf32>
    %29 = arith.mulf %28, %21 : vector<16x128xf32>
    %cst_17 = arith.constant 0.000000e+00 : f32
    %30 = vector.broadcast %cst_17 : f32 to vector<16x128xf32>
    %31 = arith.cmpf oeq, %18, %30 : vector<16x128xf32>
    %cst_18 = arith.constant 1.000000e+00 : f32
    %32 = vector.broadcast %cst_18 : f32 to vector<16x128xf32>
    %33 = arith.select %31, %32, %29 : vector<16x128xi1>, vector<16x128xf32>
    %34 = arith.mulf %1, %33 : vector<16x128xf32>
    %c0_19 = arith.constant 0 : index
    %c0_20 = arith.constant 0 : index
    %c0_21 = arith.constant 0 : index
    %c0_22 = arith.constant 0 : index
    %35 = vector.load %arg4[%c0_19, %c0_20, %c0_21, %c0_22] : memref<2x1x16x128xf32, #tpu.memory_space<vmem>>, vector<1x1x16x128xf32>
    %36 = vector.shape_cast %35 : vector<1x1x16x128xf32> to vector<16x128xf32>
    %37 = vector.shape_cast %34 : vector<16x128xf32> to vector<1x1x16x128xf32>
    tpu.vector_store %arg4[%c0_19, %c0_20, %c0_21, %c0_22], %37 {strides = array<i32>} : memref<2x1x16x128xf32, #tpu.memory_space<vmem>>, vector<1x1x16x128xf32>,
    %38 = arith.mulf %3, %33 : vector<16x128xf32>
    %c1_23 = arith.constant 1 : index
    %c0_24 = arith.constant 0 : index
    %c0_25 = arith.constant 0 : index
    %c0_26 = arith.constant 0 : index
    %39 = vector.load %arg4[%c1_23, %c0_24, %c0_25, %c0_26] : memref<2x1x16x128xf32, #tpu.memory_space<vmem>>, vector<1x1x16x128xf32>
    %40 = vector.shape_cast %39 : vector<1x1x16x128xf32> to vector<16x128xf32>
    %41 = vector.shape_cast %38 : vector<16x128xf32> to vector<1x1x16x128xf32>
    tpu.vector_store %arg4[%c1_23, %c0_24, %c0_25, %c0_26], %41 {strides = array<i32>} : memref<2x1x16x128xf32, #tpu.memory_space<vmem>>, vector<1x1x16x128xf32>,
    return
  }
  func.func @transform_0(%arg0: i32, %arg1: i32) -> (i32, i32, i32) {
    %c0_i32 = arith.constant 0 : i32
    %c0_i32_0 = arith.constant 0 : i32
    %c0_i32_1 = arith.constant 0 : i32
    return %c0_i32, %arg0, %c0_i32_0 : i32, i32, i32
  }
  func.func @transform_1(%arg0: i32, %arg1: i32) -> (i32, i32, i32, i32) {
    %c0_i32 = arith.constant 0 : i32
    %c0_i32_0 = arith.constant 0 : i32
    %c0_i32_1 = arith.constant 0 : i32
    return %c0_i32, %arg1, %arg0, %c0_i32_0 : i32, i32, i32, i32
  }
  func.func @transform_2(%arg0: i32, %arg1: i32) -> (i32, i32, i32, i32) {
    %c0_i32 = arith.constant 0 : i32
    %c0_i32_0 = arith.constant 0 : i32
    %c0_i32_1 = arith.constant 0 : i32
    return %c0_i32, %arg1, %arg0, %c0_i32_0 : i32, i32, i32, i32
  }
}

</mosaic_0001>

<bundles_post_ra>
// kernel: _general_adaptive_forward.1
= control target key start
LH: loop header
LB: loop body
LE: loop exit
PB: predicated region body
PF: predicated region fallthrough
CT: control target
= control target key end

     0   :  { %s578_s9 = smov 0   ;;  %s580_s10 = smov 0   ;;  %s666_s0 = inlined_call_operand.vmem [shape: bf16[4,16,128], index: 0, kind: input, shape index: {}]   ;;  %s667_s1 = inlined_call_operand.vmem [shape: f32[2,2,16,128], index: 1, kind: input, shape index: {}, may-alias: {1,2}]   ;;  %s668_s2 = inlined_call_operand.vmem [shape: f32[2,2,16,128], index: 2, kind: output, shape index: {}, may-alias: {1,2}]  }
   0x1   :  { %s582_s11 = smov 0   ;;  %s584_s12 = smov 0  }
   0x2   :  { %s586_s13 = smov 0  }
   0x3 LB: > { %s21_s14 = sadd.s32 1, %s557_s12  ;;  %s432_s15 = sadd.s32 4294967295, %s561_s13   ;;  %s561_s13 = sphi %s586_s13, %s12_s13   ;;  %s557_s12 = sphi %s584_s12, %s673_s12   ;;  %s553_s11 = sphi %s582_s11, %s672_s11   ;;  %s549_s10 = sphi %s580_s10, %s671_s10   ;;  %s545_s9 = sphi %s578_s9, %s670_s9  }
   0x4   : > { %p22_p0 = scmp.ge.s32.totalorder %s21_s14, 2  ;;  %p66_p1 = scmp.ne.s32.totalorder %s549_s10, %s545_s9 }
   0x5   : > { %p67_p2 = scmp.eq.s32.totalorder %s561_s13, 0  ;;  %p98_p4 = scmp.eq.s32.totalorder %s432_s15, 1 }
   0x6   : > { %s675_s14 = smov (%p22_p0, %s21_s14), 0  ;;  %s59_s17 = sadd.s32 1, %s549_s10 }
   0x7   : > { %p68_p3 = por %p67_p2, %p66_p1  ;;  %s54_s16 = ssub.s32 %s557_s12, %s675_s14 }
   0x8   : > { %p57_p5 = scmp.eq.s32.totalorder %s54_s16, 0  ;;  %p613_p6 = por %p98_p4, %p66_p1 }
   0x9   : > { %p436_p7 = scmp.ge.s32.totalorder %s561_s13, 2 }
   0xa   : > { %s618_s19 = scalar_select %p57_p5, %s549_s10, %s59_s17  }
   0xb   : > { %129 = sbr.rel (%p436_p7) target bundleno = 22 (0x16), region = 20 }
  0x10   : > { %132 = sbr.rel (!%p68_p3) target bundleno = 22 (0x16), region = 24  ;;  %s134_s20 = sand.u32 (%p68_p3), 1, %s549_s10  }
  0x11   : > { %s458_s21 = sshll.u32 (%p68_p3), %s557_s12, 4  ;;  %s437_s22 = sshll.u32 (%p68_p3), %s134_s20, 5 }
  0x12   : > { %s141_s25 = scalar_lea.vmem (%p68_p3), %s667_s1, %s458_s21  ;;  %s136_s26 = scalar_lea.vmem (%p68_p3), [#allocation2], %s437_s22 }
  0x13   : > { %v176_v0 = vld [vmem:[%s141_s25] sm:$0xff] (%p68_p3)  ;;  %v178_v1 = vld [vmem:[%s141_s25 + $0x8] sm:$0xff] (%p68_p3) }
  0x14   : > { %v180_v2 = vld [vmem:[%s141_s25 + $0x20] sm:$0xff] (%p68_p3)  ;;  %177 = vst [vmem:[%s136_s26] sm:$0xff] (%p68_p3), %v176_v0  ;;  %179 = vst [vmem:[%s136_s26 + $0x8] sm:$0xff] (%p68_p3), %v178_v1  ;;  %v182_v3 = vld [vmem:[%s141_s25 + $0x28] sm:$0xff] (%p68_p3) }
  0x15   : > { %181 = vst [vmem:[%s136_s26 + $0x10] sm:$0xff] %v180_v2  ;;  %183 = vst [vmem:[%s136_s26 + $0x18] sm:$0xff] %v182_v3 }
  0x16 PF: > { %p440_p8 = scmp.ge.s32.totalorder %s561_s13, 1  ;;  %p188_p9 = scmp.lt.s32.totalorder %s561_s13, 3 }
  0x18   : > { %p189_p10 = pnand %p440_p8, %p188_p9 }
  0x19   : > { %s195_s27 = sand.u32 (!%p189_p10), 1, %s545_s9  }
  0x1a   : > { %192 = sbr.rel (%p189_p10) target bundleno = 79 (0x4f), region = 62  ;;  %s629_s28 = sshll.u32 (!%p189_p10), %s195_s27, 5 }
  0x1b   : > { %s197_s29 = scalar_lea.vmem (!%p189_p10), [#allocation2], %s629_s28  ;;  %s219_s15 = scalar_lea.vmem (!%p189_p10), [#allocation3], %s629_s28 }
  0x1f   : > { %v228_v4 = vld [vmem:[%s197_s29] sm:$0xff]  ;;  %v443_v5 = vld [vmem:[%s197_s29 + $0x10] sm:$0xff]  ;;  %v229_v6 = vld [vmem:[%s197_s29 + $0x8] sm:$0xff]  ;;  %s459_s16 = sshll.u32 (%p613_p6), %s553_s11, 4 }
  0x20   : > { %v252_v7 = vmul.f32 %v228_v4, %v228_v4  ;;  %v254_v8 = vmul.f32 %v443_v5, %v443_v5  ;;  %v444_v9 = vld [vmem:[%s197_s29 + $0x18] sm:$0xff]  ;;  %v253_v10 = vmul.f32 %v229_v6, %v229_v6  ;;  %v461_v16 = vld [vmem:[%s666_s0] sm:$0xff]   ;;  %v476_v17 = vld [vmem:[%s666_s0 + $0x8] sm:$0xff]   ;;  %s300_s21 = scalar_lea.vmem (%p613_p6), %s668_s2, %s459_s16 }
  0x21   : > { %v255_v11 = vmul.f32 %v444_v9, %v444_v9  ;;  %v462_v18 = vunpack.c.l.bf16 %v461_v16  ;;  %v463_v20 = vunpack.c.h.bf16 %v461_v16  ;;  %v466_v22 = vunpack.c.l.bf16 %v476_v17  ;;  %v477_v24 = vld [vmem:[%s666_s0 + $0x10] sm:$0xff]   ;;  %v478_v28 = vld [vmem:[%s666_s0 + $0x18] sm:$0xff]  }
  0x22   : > { %v256_v12 = vadd.f32 %v254_v8, %v252_v7  ;;  %v467_v25 = vunpack.c.h.bf16 %v476_v17  ;;  %v470_v30 = vunpack.c.l.bf16 %v477_v24  ;;  %v471_v32 = vunpack.c.h.bf16 %v477_v24 }
  0x23   : > { %v257_v13 = vadd.f32 %v255_v11, %v253_v10  ;;  %v474_v34 = vunpack.c.l.bf16 %v478_v28  ;;  %v475_v36 = vunpack.c.h.bf16 %v478_v28 }
  0x24   : > { %v258_v14 = vadd.f32 1e-32, %v256_v12  ;;  %vm276_vm0 = vcmp.eq.f32.partialorder %v256_v12, 0.0 }
  0x25   : > { %v259_v15 = vadd.f32 1e-32, %v257_v13  ;;  %vm277_vm1 = vcmp.eq.f32.partialorder %v257_v13, 0.0 }
  0x26   : > { %519 = vrsqrt.f32 %v258_v14 }
  0x27   : > { %521 = vrsqrt.f32 %v259_v15 }
  0x33   : > { %v520_v19 = vpop.eup %519 }
  0x34   : > { %v522_v21 = vpop.eup %521  ;;  %v262_v23 = vmul.f32 %v520_v19, %v256_v12 }
  0x35   : > { %v263_v26 = vmul.f32 %v522_v21, %v257_v13 }
  0x36   : > { %v264_v27 = vmul.f32 %v462_v18, %v262_v23 }
  0x37   : > { %v265_v29 = vmul.f32 %v463_v20, %v263_v26 }
  0x38   : > { %v266_v31 = vadd.f32 %v466_v22, %v264_v27 }
  0x39   : > { %v267_v33 = vadd.f32 %v467_v25, %v265_v29 }
  0x3a   : > { %v268_v35 = vmax.f32 %v266_v31, 0.0 }
  0x3b   : > { %v269_v37 = vmax.f32 %v267_v33, 0.0 }
  0x3c   : > { %v270_v38 = vmul.f32 %v470_v30, %v268_v35 }
  0x3d   : > { %v271_v39 = vmul.f32 %v471_v32, %v269_v37 }
  0x3e   : > { %v272_v40 = vadd.f32 %v474_v34, %v270_v38 }
  0x3f   : > { %v273_v41 = vadd.f32 %v475_v36, %v271_v39 }
  0x40   : > { %v274_v42 = vmul.f32 %v520_v19, %v272_v40 }
  0x41   : > { %v275_v43 = vmul.f32 %v522_v21, %v273_v41 }
  0x42   : > { %v278_v44 = vsel %vm276_vm0, 1.0, %v274_v42  ;;  %295 = sbr.rel (!%p613_p6) target bundleno = 79 (0x4f), region = 70 }
  0x43   : > { %v280_v45 = vmul.f32 %v278_v44, %v228_v4  ;;  %v279_v46 = vsel %vm277_vm1, 1.0, %v275_v43  ;;  %v284_v47 = vmul.f32 %v443_v5, %v278_v44 }
  0x44   : > { %v281_v48 = vmul.f32 %v279_v46, %v229_v6  ;;  %v285_v49 = vmul.f32 %v444_v9, %v279_v46 }
  0x45   : > { %282 = vst [vmem:[%s219_s15] sm:$0xff] %v280_v45  ;;  %451 = vst [vmem:[%s219_s15 + $0x10] sm:$0xff] %v284_v47 }
  0x46   : > { %283 = vst [vmem:[%s219_s15 + $0x8] sm:$0xff] %v281_v48  ;;  %452 = vst [vmem:[%s219_s15 + $0x18] sm:$0xff] %v285_v49 }
  0x4c   : > { %v335_v50 = vld [vmem:[%s219_s15] sm:$0xff]  ;;  %v339_v52 = vld [vmem:[%s219_s15 + $0x10] sm:$0xff] }
  0x4d   : > { %v337_v51 = vld [vmem:[%s219_s15 + $0x8] sm:$0xff]  ;;  %v341_v53 = vld [vmem:[%s219_s15 + $0x18] sm:$0xff]  ;;  %336 = vst [vmem:[%s300_s21] sm:$0xff] %v335_v50  ;;  %340 = vst [vmem:[%s300_s21 + $0x20] sm:$0xff] %v339_v52 }
  0x4e   : > { %338 = vst [vmem:[%s300_s21 + $0x8] sm:$0xff] %v337_v51  ;;  %342 = vst [vmem:[%s300_s21 + $0x28] sm:$0xff] %v341_v53 }
  0x4f PF: > { %s12_s13 = sadd.s32 1, %s561_s13   ;;  %s670_s9 = smov %s549_s10 }
  0x50   : > { %p9_p11 = scmp.ge.s32.totalorder %s12_s13, 4   ;;  %s671_s10 = smov %s618_s19 }
  0x51   : > { %s672_s11 = smov %s557_s12  ;;  %s673_s12 = smov %s675_s14 }
  0x52   :  { %11 = sbr.rel (!%p9_p11) target bundleno = 3 (0x3), region = 147 }

// kernel: reverse.0
= control target key start
LH: loop header
LB: loop body
LE: loop exit
PB: predicated region body
PF: predicated region fallthrough
CT: control target
= control target key end

     0   :  { %v72_v3 = vlaneseq  ;;  %v65_v9 = vld [vmem:[#allocation0 + $0x7] ss:$-1 sm:$0xff]  ;;  %v79_v12 = vld [vmem:[#allocation0 + $0x17] ss:$-1 sm:$0xff]  ;;  %s331_s0 = inlined_call_operand.vmem [shape: f32[2,4,16,7], index: 0, kind: input, shape index: {}]   ;;  %s332_s1 = inlined_call_operand.vmem [shape: f32[2,4,16,7], index: 1, kind: output, shape index: {}]  }
   0x1   :  { %v45_v0 = vld [vmem:[%s331_s0] sm:$0xff]  ;;  %v47_v1 = vld [vmem:[%s331_s0 + $0x8] sm:$0xff]  ;;  %v49_v2 = vld [vmem:[%s331_s0 + $0x10] sm:$0xff]  ;;  %v66_v10 = vrot.slane %v65_v9, 1  ;;  %v80_v14 = vrot.slane %v79_v12, 1 }
   0x2   :  { %46 = vst [vmem:[#allocation0 + $0x8] sm:$0xff] %v45_v0  ;;  %48 = vst [vmem:[#allocation0 + $0x18] sm:$0xff] %v47_v1  ;;  %v51_v4 = vld [vmem:[%s331_s0 + $0x18] sm:$0xff]  ;;  %v53_v5 = vld [vmem:[%s331_s0 + $0x20] sm:$0xff]  ;;  %v73_v11 = vshrl.u32 %v72_v3, 7 }
   0x3   :  { %50 = vst [vmem:[#allocation0 + $0x28] sm:$0xff] %v49_v2  ;;  %v55_v6 = vld [vmem:[%s331_s0 + $0x28] sm:$0xff]  ;;  %52 = vst [vmem:[#allocation0 + $0x38] sm:$0xff] %v51_v4  ;;  %v57_v7 = vld [vmem:[%s331_s0 + $0x30] sm:$0xff] }
   0x4   :  { %54 = vst [vmem:[#allocation0 + $0x48] sm:$0xff] %v53_v5  ;;  %56 = vst [vmem:[#allocation0 + $0x58] sm:$0xff] %v55_v6  ;;  %v59_v8 = vld [vmem:[%s331_s0 + $0x38] sm:$0xff]  ;;  %v93_v13 = vld [vmem:[#allocation0 + $0x27] ss:$-1 sm:$0xff]  ;;  %vm74_vm0 = vcmp.lt.s32.totalorder %v73_v11, 7 }
   0x5   :  { %58 = vst [vmem:[#allocation0 + $0x68] sm:$0xff] %v57_v7  ;;  %60 = vst [vmem:[#allocation0 + $0x78] sm:$0xff] %v59_v8  ;;  %v94_v15 = vrot.slane %v93_v13, 1  ;;  %v107_v16 = vld [vmem:[#allocation0 + $0x37] ss:$-1 sm:$0xff] }
   0x6   :  { %67 = vst [vmem:[#allocation1] sm:$0xff] %v66_v10  ;;  %v108_v17 = vrot.slane %v107_v16, 1  ;;  %v121_v18 = vld [vmem:[#allocation0 + $0x47] ss:$-1 sm:$0xff]  ;;  %v135_v19 = vld [vmem:[#allocation0 + $0x57] ss:$-1 sm:$0xff] }
   0x7   :  { %81 = vst [vmem:[#allocation1 + $0x8] sm:$0xff] %v80_v14  ;;  %95 = vst [vmem:[#allocation1 + $0x10] sm:$0xff] %v94_v15  ;;  %v122_v20 = vrot.slane %v121_v18, 1  ;;  %v136_v21 = vrot.slane %v135_v19, 1  ;;  %v149_v22 = vld [vmem:[#allocation0 + $0x67] ss:$-1 sm:$0xff] }
   0x8   :  { %v163_v23 = vld [vmem:[#allocation0 + $0x77] ss:$-1 sm:$0xff]  ;;  %109 = vst [vmem:[#allocation1 + $0x18] sm:$0xff] %v108_v17  ;;  %v150_v24 = vrot.slane %v149_v22, 1 }
   0x9   :  { %v164_v25 = vrot.slane %v163_v23, 1  ;;  %v70_v26 = vld [vmem:[#allocation0 + $0xf] ss:$-1 sm:$0xff]  ;;  %v84_v27 = vld [vmem:[#allocation0 + $0x1f] ss:$-1 sm:$0xff]  ;;  %123 = vst [vmem:[#allocation1 + $0x20] sm:$0xff] %v122_v20 }
   0xa   :  { %v98_v28 = vld [vmem:[#allocation0 + $0x2f] ss:$-1 sm:$0xff]  ;;  %137 = vst [vmem:[#allocation1 + $0x28] sm:$0xff] %v136_v21  ;;  %v71_v29 = vrot.slane %v70_v26, 1  ;;  %v85_v30 = vrot.slane %v84_v27, 1  ;;  %151 = vst [vmem:[#allocation1 + $0x30] sm:$0xff] %v150_v24 }
   0xb   :  { %v99_v31 = vrot.slane %v98_v28, 1  ;;  %v112_v32 = vld [vmem:[#allocation0 + $0x3f] ss:$-1 sm:$0xff]  ;;  %165 = vst [vmem:[#allocation1 + $0x38] sm:$0xff] %v164_v25  ;;  %v126_v34 = vld [vmem:[#allocation0 + $0x4f] ss:$-1 sm:$0xff] }
   0xc   :  { %v113_v33 = vrot.slane %v112_v32, 1  ;;  %v140_v35 = vld [vmem:[#allocation0 + $0x5f] ss:$-1 sm:$0xff]  ;;  %75 = vst.msk [vmem:[#allocation1] sm:$0xff] %vm74_vm0, %v71_v29  ;;  %89 = vst.msk [vmem:[#allocation1 + $0x8] sm:$0xff] %vm74_vm0, %v85_v30  ;;  %v127_v36 = vrot.slane %v126_v34, 1 }
   0xd   :  { %103 = vst.msk [vmem:[#allocation1 + $0x10] sm:$0xff] %vm74_vm0, %v99_v31  ;;  %v141_v37 = vrot.slane %v140_v35, 1  ;;  %v154_v38 = vld [vmem:[#allocation0 + $0x6f] ss:$-1 sm:$0xff]  ;;  %v168_v39 = vld [vmem:[#allocation0 + $0x7f] ss:$-1 sm:$0xff] }
   0xe   :  { %117 = vst.msk [vmem:[#allocation1 + $0x18] sm:$0xff] %vm74_vm0, %v113_v33  ;;  %v155_v40 = vrot.slane %v154_v38, 1  ;;  %v169_v41 = vrot.slane %v168_v39, 1  ;;  %131 = vst.msk [vmem:[#allocation1 + $0x20] sm:$0xff] %vm74_vm0, %v127_v36 }
   0xf   :  { %145 = vst.msk [vmem:[#allocation1 + $0x28] sm:$0xff] %vm74_vm0, %v141_v37 }
  0x10   :  { %159 = vst.msk [vmem:[#allocation1 + $0x30] sm:$0xff] %vm74_vm0, %v155_v40  ;;  %173 = vst.msk [vmem:[#allocation1 + $0x38] sm:$0xff] %vm74_vm0, %v169_v41 }
  0x13   :  { %v216_v42 = vld [vmem:[#allocation1] sm:$0xff]  ;;  %v218_v43 = vld [vmem:[#allocation1 + $0x8] sm:$0xff] }
  0x14   :  { %v220_v44 = vld [vmem:[#allocation1 + $0x10] sm:$0xff]  ;;  %217 = vst [vmem:[%s332_s1] sm:$0xff] %v216_v42  ;;  %219 = vst [vmem:[%s332_s1 + $0x8] sm:$0xff] %v218_v43 }
  0x15   :  { %221 = vst [vmem:[%s332_s1 + $0x10] sm:$0xff] %v220_v44  ;;  %v222_v45 = vld [vmem:[#allocation1 + $0x18] sm:$0xff]  ;;  %v224_v46 = vld [vmem:[#allocation1 + $0x20] sm:$0xff] }
  0x16   :  { %223 = vst [vmem:[%s332_s1 + $0x18] sm:$0xff] %v222_v45  ;;  %v226_v47 = vld [vmem:[#allocation1 + $0x28] sm:$0xff]  ;;  %225 = vst [vmem:[%s332_s1 + $0x20] sm:$0xff] %v224_v46 }
  0x17   :  { %227 = vst [vmem:[%s332_s1 + $0x28] sm:$0xff] %v226_v47  ;;  %v228_v48 = vld [vmem:[#allocation1 + $0x30] sm:$0xff]  ;;  %v230_v49 = vld [vmem:[#allocation1 + $0x38] sm:$0xff] }
  0x18   :  { %229 = vst [vmem:[%s332_s1 + $0x30] sm:$0xff] %v228_v48  ;;  %231 = vst [vmem:[%s332_s1 + $0x38] sm:$0xff] %v230_v49 }

</bundles_post_ra>
